<compile_context>
chip_gen: v6e
topology: v6e:2x2x1
jax: 0.10.0
libtpu: 0.0.40
codegen_flags: <defaults>
</compile_context>

<pallas_src>
import functools

import jax
import jax.numpy as jnp
import numpy as np
from jax import lax
from jax.experimental import pallas as pl
from jax.experimental.pallas import tpu as pltpu

LANE = 128


def _mha_kernel(k_ref, v_ref, q_ref,
                wk_ref, bk_ref, wv_ref, bv_ref, wq_ref, bq_ref, wo_ref, bo_ref,
                o_ref, *, heads, channels, hiddens):
    b_blk = k_ref.shape[0]
    S = k_ref.shape[-1]
    Tb = q_ref.shape[-1]

    # Activations arrive in f32; cast to bf16 for the MXU (f32 accumulation below).
    k = k_ref[...].astype(jnp.bfloat16)          # [Bb, keys_ch,    S]
    v = v_ref[...].astype(jnp.bfloat16)          # [Bb, values_ch,  S]
    q = q_ref[...].astype(jnp.bfloat16)          # [Bb, queries_ch, Tb]

    # Resident bf16 weights broadcast over the folded batch block so each 1x1-conv
    # projection is one batched MXU call (batch = b_blk).
    wk = jnp.broadcast_to(wk_ref[...], (b_blk,) + wk_ref.shape)
    wv = jnp.broadcast_to(wv_ref[...], (b_blk,) + wv_ref.shape)
    wq = jnp.broadcast_to(wq_ref[...], (b_blk,) + wq_ref.shape)  # 1/sqrt(C) pre-folded
    wo = jnp.broadcast_to(wo_ref[...], (b_blk,) + wo_ref.shape)

    dn = (((2,), (1,)), ((0,), (0,)))            # contract input channels, batch over Bb
    K = lax.dot_general(wk, k, dn, preferred_element_type=jnp.float32) + bk_ref[...]
    V = lax.dot_general(wv, v, dn, preferred_element_type=jnp.float32) + bv_ref[...]
    Q = lax.dot_general(wq, q, dn, preferred_element_type=jnp.float32) + bq_ref[...]
    # K, V: [Bb, hiddens, S];  Q: [Bb, hiddens, Tb]  (f32; scale already folded into wq/bq)

    bh = b_blk * heads
    Kh = K.reshape(bh, channels, S).astype(jnp.bfloat16)
    Vh = V.reshape(bh, channels, S).astype(jnp.bfloat16)
    Qh = Q.reshape(bh, channels, Tb).astype(jnp.bfloat16)

    # score[bh, s, t] = sum_c Kh[bh, c, s] * Qh[bh, c, t]   (single batched dot)
    score = lax.dot_general(Kh, Qh, (((1,), (1,)), ((0,), (0,))),
                            preferred_element_type=jnp.float32)      # [Bb*H, S, Tb]

    # softmax over the key axis S (PyTorch: softmax(score, dim=2)); stats stay f32.
    m = jnp.max(score, axis=1, keepdims=True)
    e = jnp.exp(score - m)
    denom = jnp.sum(e, axis=1, keepdims=True)
    w = (e * pl.reciprocal(denom, approx=True)).astype(jnp.bfloat16)  # [Bb*H, S, Tb]

    # att[bh, c, t] = sum_s Vh[bh, c, s] * w[bh, s, t]
    att = lax.dot_general(Vh, w, (((2,), (1,)), ((0,), (0,))),
                          preferred_element_type=jnp.float32)         # [Bb*H, C, Tb]
    att = att.reshape(b_blk, hiddens, Tb).astype(jnp.bfloat16)

    # TODO(synk): optional `mask` branch (masked_fill_ with -inf and output gating)
    # is not implemented; this kernel covers the mask=None path.
    out = lax.dot_general(wo, att, dn, preferred_element_type=jnp.float32) + bo_ref[...]
    o_ref[...] = out                                                   # [Bb, out_ch, Tb] f32


def prepare_params(params, *, heads):
    """One-time weight prep (hoisted out of the forward path): bf16 casts, bias
    reshapes, and channels**-0.5 folded into the query projection."""
    wk, bk, wv, bv, wq, bq, wo, bo = params
    hiddens = wk.shape[0]
    out_channels = wo.shape[0]
    channels = hiddens // heads
    scale = channels ** -0.5
    return (
        wk.astype(jnp.bfloat16), bk.reshape(hiddens, 1).astype(jnp.float32),
        wv.astype(jnp.bfloat16), bv.reshape(hiddens, 1).astype(jnp.float32),
        (wq * scale).astype(jnp.bfloat16),
        (bq * scale).reshape(hiddens, 1).astype(jnp.float32),
        wo.astype(jnp.bfloat16), bo.reshape(out_channels, 1).astype(jnp.float32),
    )


@functools.partial(jax.jit, static_argnames=("heads",))
def multihead_attention(keys, values, queries, prepped, *, heads):
    """keys:[B,keys,S], values:[B,values,S], queries:[B,queries,T] -> [B,out_channels,T]."""
    wk, bk, wv, bv, wq, bq, wo, bo = prepped
    B, keys_ch, S = keys.shape
    values_ch = values.shape[1]
    queries_ch, T = queries.shape[1], queries.shape[2]
    hiddens = wk.shape[0]
    out_channels = wo.shape[0]
    channels = hiddens // heads

    # Lane-dense output length: pad T to a multiple of 128, tile it at <= 512 columns.
    T_pad = max(LANE, pl.cdiv(T, LANE) * LANE)
    if T_pad <= 512:
        t_blk = T_pad
    else:
        t_blk = max(t for t in (128, 256, 384, 512) if T_pad % t == 0)
    n_t = T_pad // t_blk

    # Fold the batch into each grid step, but keep >= 2 parallel steps when possible
    # (v7x has two TensorCores; v5e/v6e don't care).
    if n_t >= 2 or B == 1 or B % 2 == 1:
        b_blk = B
    else:
        b_blk = B // 2
    n_b = B // b_blk

    q_p = queries if T_pad == T else jnp.pad(queries, ((0, 0), (0, 0), (0, T_pad - T)))

    kernel = functools.partial(_mha_kernel, heads=heads, channels=channels,
                               hiddens=hiddens)

    # Rough VMEM budget for this tiling (double-buffered IO blocks + f32 intermediates).
    f32b, bf16b = 4, 2
    bh = b_blk * heads
    est = (2 * b_blk * ((keys_ch + values_ch) * S + queries_ch * t_blk) * f32b
           + 2 * b_blk * out_channels * t_blk * f32b
           + (hiddens * (keys_ch + values_ch + queries_ch) + out_channels * hiddens) * bf16b
           + (3 * hiddens + out_channels) * f32b
           + b_blk * hiddens * (2 * S + t_blk) * (f32b + bf16b)
           + bh * S * t_blk * (3 * f32b + bf16b)
           + b_blk * hiddens * t_blk * (f32b + bf16b)
           + b_blk * out_channels * t_blk * f32b)
    vmem_limit = int(min(64 << 20, max(32 << 20, 1.5 * est)))

    flops = 2 * B * (hiddens * keys_ch * S
                     + hiddens * values_ch * S
                     + hiddens * queries_ch * T_pad
                     + 2 * hiddens * S * T_pad
                     + out_channels * hiddens * T_pad)
    bytes_accessed = (B * (keys_ch + values_ch) * S * 4
                      + B * queries_ch * T_pad * 4
                      + (hiddens * (keys_ch + values_ch + queries_ch)
                         + out_channels * hiddens) * 2
                      + (3 * hiddens + out_channels) * 4
                      + B * out_channels * T_pad * 4)
    cost = pl.CostEstimate(flops=flops,
                           transcendentals=B * heads * S * T_pad,
                           bytes_accessed=bytes_accessed)

    def seq_spec(c):        # S-length activations: resident across T blocks
        return pl.BlockSpec((b_blk, c, S), lambda bi, ti: (bi, 0, 0))

    def t_spec(c):          # T-length activations / output
        return pl.BlockSpec((b_blk, c, t_blk), lambda bi, ti: (bi, 0, ti))

    def w_spec(shape):      # weights: resident across the whole grid
        return pl.BlockSpec(shape, lambda bi, ti: (0,) * len(shape))

    out = pl.pallas_call(
        kernel,
        out_shape=jax.ShapeDtypeStruct((B, out_channels, T_pad), jnp.float32),
        grid=(n_b, n_t),
        in_specs=[
            seq_spec(keys_ch),
            seq_spec(values_ch),
            t_spec(queries_ch),
            w_spec((hiddens, keys_ch)), w_spec((hiddens, 1)),
            w_spec((hiddens, values_ch)), w_spec((hiddens, 1)),
            w_spec((hiddens, queries_ch)), w_spec((hiddens, 1)),
            w_spec((out_channels, hiddens)), w_spec((out_channels, 1)),
        ],
        out_specs=t_spec(out_channels),
        compiler_params=pltpu.CompilerParams(
            dimension_semantics=("parallel", "parallel"),
            vmem_limit_bytes=vmem_limit),
        cost_estimate=cost,
    )(keys, values, q_p, wk, bk, wv, bv, wq, bq, wo, bo)

    return out[:, :, :T]


def _reference(keys, values, queries, params, *, heads):
    """Plain-JAX (f32) transcription of the PyTorch forward (mask=None)."""
    wk, bk, wv, bv, wq, bq, wo, bo = params
    B, _, S = keys.shape
    T = queries.shape[-1]
    hiddens = wk.shape[0]
    channels = hiddens // heads

    K = jnp.einsum('oi,bis->bos', wk, keys) + bk[None, :, None]
    V = jnp.einsum('oi,bis->bos', wv, values) + bv[None, :, None]
    Q = jnp.einsum('oi,bit->bot', wq, queries) + bq[None, :, None]

    Kh = K.reshape(B, heads, channels, S)
    Vh = V.reshape(B, heads, channels, S)
    Qh = Q.reshape(B, heads, channels, T)

    score = jnp.einsum('bhcs,bhct->bhst', Kh, Qh) * channels ** (-0.5)
    w = jax.nn.softmax(score, axis=2)
    out = jnp.einsum('bhcs,bhst->bhct', Vh, w).reshape(B, hiddens, T)
    return jnp.einsum('oi,bit->bot', wo, out) + bo[None, :, None]


if __name__ == "__main__":
    B = 4
    KEYS_CH, VALUES_CH, QUERIES_CH = 12, 10, 14
    OUT_CH, HIDDENS, HEADS = 20, 32, 4
    S, T = 16, 24

    key = jax.random.PRNGKey(0)
    ks = jax.random.split(key, 11)

    keys_in = jax.random.normal(ks[0], (B, KEYS_CH, S), jnp.float32)
    values_in = jax.random.normal(ks[1], (B, VALUES_CH, S), jnp.float32)
    queries_in = jax.random.normal(ks[2], (B, QUERIES_CH, T), jnp.float32)

    # Deterministic parameter init (Conv1d kernel-size-1 weights stored as [out, in]).
    params = (
        0.1 * jax.random.normal(ks[3], (HIDDENS, KEYS_CH), jnp.float32),
        0.1 * jax.random.normal(ks[4], (HIDDENS,), jnp.float32),
        0.1 * jax.random.normal(ks[5], (HIDDENS, VALUES_CH), jnp.float32),
        0.1 * jax.random.normal(ks[6], (HIDDENS,), jnp.float32),
        0.1 * jax.random.normal(ks[7], (HIDDENS, QUERIES_CH), jnp.float32),
        0.1 * jax.random.normal(ks[8], (HIDDENS,), jnp.float32),
        0.1 * jax.random.normal(ks[9], (OUT_CH, HIDDENS), jnp.float32),
        0.1 * jax.random.normal(ks[10], (OUT_CH,), jnp.float32),
    )

    # One-time weight prep (bf16 casts, bias reshapes, 1/sqrt(C) folded into wq/bq).
    prepped = prepare_params(params, heads=HEADS)

    out = multihead_attention(keys_in, values_in, queries_in, prepped, heads=HEADS)
    out = jax.block_until_ready(out)

    ref = _reference(keys_in, values_in, queries_in, params, heads=HEADS)
    # bf16 MXU operands (f32 accumulation) => loosened tolerance vs. the f32 reference.
    np.testing.assert_allclose(np.asarray(out), np.asarray(ref), rtol=2e-2, atol=2e-2)

    print("KERNEL_OK")
</pallas_src>

<mosaic_0001>
module attributes {stable_mosaic.version = 11 : i64} {
  func.func @_mha_kernel(%arg0: i32, %arg1: i32, %arg2: memref<2x12x16xf32, #tpu.memory_space<vmem>>, %arg3: memref<2x10x16xf32, #tpu.memory_space<vmem>>, %arg4: memref<2x14x128xf32, #tpu.memory_space<vmem>>, %arg5: memref<32x12xbf16, #tpu.memory_space<vmem>>, %arg6: memref<32x1xf32, #tpu.memory_space<vmem>>, %arg7: memref<32x10xbf16, #tpu.memory_space<vmem>>, %arg8: memref<32x1xf32, #tpu.memory_space<vmem>>, %arg9: memref<32x14xbf16, #tpu.memory_space<vmem>>, %arg10: memref<32x1xf32, #tpu.memory_space<vmem>>, %arg11: memref<20x32xbf16, #tpu.memory_space<vmem>>, %arg12: memref<20x1xf32, #tpu.memory_space<vmem>>, %arg13: memref<2x20x128xf32, #tpu.memory_space<vmem>>) attributes {dimension_semantics = [#tpu.dimension_semantics<parallel>, #tpu.dimension_semantics<parallel>], iteration_bounds = array<i64: 2, 1>, scalar_prefetch = 0 : i64, scratch_operands = 0 : i64, tpu.core_type = #tpu.core_type<tc>, window_params = [{transform_indices = @transform_0, window_bounds = array<i64: 2, 12, 16>}, {transform_indices = @transform_1, window_bounds = array<i64: 2, 10, 16>}, {transform_indices = @transform_2, window_bounds = array<i64: 2, 14, 128>}, {pipeline_mode = #tpu.pipeline_mode<synchronous>, transform_indices = @transform_3, window_bounds = array<i64: 32, 12>}, {pipeline_mode = #tpu.pipeline_mode<synchronous>, transform_indices = @transform_4, window_bounds = array<i64: 32, 1>}, {pipeline_mode = #tpu.pipeline_mode<synchronous>, transform_indices = @transform_5, window_bounds = array<i64: 32, 10>}, {pipeline_mode = #tpu.pipeline_mode<synchronous>, transform_indices = @transform_6, window_bounds = array<i64: 32, 1>}, {pipeline_mode = #tpu.pipeline_mode<synchronous>, transform_indices = @transform_7, window_bounds = array<i64: 32, 14>}, {pipeline_mode = #tpu.pipeline_mode<synchronous>, transform_indices = @transform_8, window_bounds = array<i64: 32, 1>}, {pipeline_mode = #tpu.pipeline_mode<synchronous>, transform_indices = @transform_9, window_bounds = array<i64: 20, 32>}, {pipeline_mode = #tpu.pipeline_mode<synchronous>, transform_indices = @transform_10, window_bounds = array<i64: 20, 1>}, {transform_indices = @transform_11, window_bounds = array<i64: 2, 20, 128>}]} {
    %c0 = arith.constant 0 : index
    %c0_0 = arith.constant 0 : index
    %c0_1 = arith.constant 0 : index
    %0 = vector.load %arg2[%c0, %c0_0, %c0_1] : memref<2x12x16xf32, #tpu.memory_space<vmem>>, vector<2x12x16xf32>
    %1 = arith.truncf %0 : vector<2x12x16xf32> to vector<2x12x16xbf16>
    %c0_2 = arith.constant 0 : index
    %c0_3 = arith.constant 0 : index
    %c0_4 = arith.constant 0 : index
    %2 = vector.load %arg3[%c0_2, %c0_3, %c0_4] : memref<2x10x16xf32, #tpu.memory_space<vmem>>, vector<2x10x16xf32>
    %3 = arith.truncf %2 : vector<2x10x16xf32> to vector<2x10x16xbf16>
    %c0_5 = arith.constant 0 : index
    %c0_6 = arith.constant 0 : index
    %c0_7 = arith.constant 0 : index
    %4 = vector.load %arg4[%c0_5, %c0_6, %c0_7] : memref<2x14x128xf32, #tpu.memory_space<vmem>>, vector<2x14x128xf32>
    %5 = arith.truncf %4 : vector<2x14x128xf32> to vector<2x14x128xbf16>
    %c0_8 = arith.constant 0 : index
    %c0_9 = arith.constant 0 : index
    %6 = vector.load %arg5[%c0_8, %c0_9] : memref<32x12xbf16, #tpu.memory_space<vmem>>, vector<32x12xbf16>
    %7 = vector.shape_cast %6 : vector<32x12xbf16> to vector<1x32x12xbf16>
    %8 = vector.broadcast %7 : vector<1x32x12xbf16> to vector<2x32x12xbf16>
    %c0_10 = arith.constant 0 : index
    %c0_11 = arith.constant 0 : index
    %9 = vector.load %arg7[%c0_10, %c0_11] : memref<32x10xbf16, #tpu.memory_space<vmem>>, vector<32x10xbf16>
    %10 = vector.shape_cast %9 : vector<32x10xbf16> to vector<1x32x10xbf16>
    %11 = vector.broadcast %10 : vector<1x32x10xbf16> to vector<2x32x10xbf16>
    %c0_12 = arith.constant 0 : index
    %c0_13 = arith.constant 0 : index
    %12 = vector.load %arg9[%c0_12, %c0_13] : memref<32x14xbf16, #tpu.memory_space<vmem>>, vector<32x14xbf16>
    %13 = vector.shape_cast %12 : vector<32x14xbf16> to vector<1x32x14xbf16>
    %14 = vector.broadcast %13 : vector<1x32x14xbf16> to vector<2x32x14xbf16>
    %c0_14 = arith.constant 0 : index
    %c0_15 = arith.constant 0 : index
    %15 = vector.load %arg11[%c0_14, %c0_15] : memref<20x32xbf16, #tpu.memory_space<vmem>>, vector<20x32xbf16>
    %16 = vector.shape_cast %15 : vector<20x32xbf16> to vector<1x20x32xbf16>
    %17 = vector.broadcast %16 : vector<1x20x32xbf16> to vector<2x20x32xbf16>
    %cst = arith.constant dense<0.000000e+00> : vector<2x32x16xf32>
    %18 = tpu.matmul %8, %1, %cst {dimension_numbers = #tpu.dot_dimension_numbers<[2], [1], [1], [2], [0, 0, 0, 1, 1, 2], [0], [0]>} : vector<2x32x12xbf16>, vector<2x12x16xbf16>, vector<2x32x16xf32> -> vector<2x32x16xf32>
    %c0_16 = arith.constant 0 : index
    %c0_17 = arith.constant 0 : index
    %19 = vector.load %arg6[%c0_16, %c0_17] : memref<32x1xf32, #tpu.memory_space<vmem>>, vector<32x1xf32>
    %20 = vector.shape_cast %19 : vector<32x1xf32> to vector<1x32x1xf32>
    %21 = vector.broadcast %20 : vector<1x32x1xf32> to vector<2x32x16xf32>
    %22 = arith.addf %18, %21 : vector<2x32x16xf32>
    %cst_18 = arith.constant dense<0.000000e+00> : vector<2x32x16xf32>
    %23 = tpu.matmul %11, %3, %cst_18 {dimension_numbers = #tpu.dot_dimension_numbers<[2], [1], [1], [2], [0, 0, 0, 1, 1, 2], [0], [0]>} : vector<2x32x10xbf16>, vector<2x10x16xbf16>, vector<2x32x16xf32> -> vector<2x32x16xf32>
    %c0_19 = arith.constant 0 : index
    %c0_20 = arith.constant 0 : index
    %24 = vector.load %arg8[%c0_19, %c0_20] : memref<32x1xf32, #tpu.memory_space<vmem>>, vector<32x1xf32>
    %25 = vector.shape_cast %24 : vector<32x1xf32> to vector<1x32x1xf32>
    %26 = vector.broadcast %25 : vector<1x32x1xf32> to vector<2x32x16xf32>
    %27 = arith.addf %23, %26 : vector<2x32x16xf32>
    %cst_21 = arith.constant dense<0.000000e+00> : vector<2x32x128xf32>
    %28 = tpu.matmul %14, %5, %cst_21 {dimension_numbers = #tpu.dot_dimension_numbers<[2], [1], [1], [2], [0, 0, 0, 1, 1, 2], [0], [0]>} : vector<2x32x14xbf16>, vector<2x14x128xbf16>, vector<2x32x128xf32> -> vector<2x32x128xf32>
    %c0_22 = arith.constant 0 : index
    %c0_23 = arith.constant 0 : index
    %29 = vector.load %arg10[%c0_22, %c0_23] : memref<32x1xf32, #tpu.memory_space<vmem>>, vector<32x1xf32>
    %30 = vector.shape_cast %29 : vector<32x1xf32> to vector<1x32x1xf32>
    %31 = vector.broadcast %30 : vector<1x32x1xf32> to vector<2x32x128xf32>
    %32 = arith.addf %28, %31 : vector<2x32x128xf32>
    %33 = vector.shape_cast %22 : vector<2x32x16xf32> to vector<8x8x16xf32>
    %34 = arith.truncf %33 : vector<8x8x16xf32> to vector<8x8x16xbf16>
    %35 = vector.shape_cast %27 : vector<2x32x16xf32> to vector<8x8x16xf32>
    %36 = arith.truncf %35 : vector<8x8x16xf32> to vector<8x8x16xbf16>
    %37 = vector.shape_cast %32 : vector<2x32x128xf32> to vector<8x8x128xf32>
    %38 = arith.truncf %37 : vector<8x8x128xf32> to vector<8x8x128xbf16>
    %cst_24 = arith.constant dense<0.000000e+00> : vector<8x16x128xf32>
    %39 = tpu.matmul %34, %38, %cst_24 {dimension_numbers = #tpu.dot_dimension_numbers<[1], [1], [2], [2], [0, 0, 0, 2, 1, 2], [0], [0]>} : vector<8x8x16xbf16>, vector<8x8x128xbf16>, vector<8x16x128xf32> -> vector<8x16x128xf32>
    %cst_25 = arith.constant dense<0xFF800000> : vector<8x128xf32>
    %40 = vector.multi_reduction <maximumf>, %39, %cst_25 [1] : vector<8x16x128xf32> to vector<8x128xf32>
    %41 = vector.shape_cast %40 : vector<8x128xf32> to vector<8x1x128xf32>
    %42 = vector.broadcast %41 : vector<8x1x128xf32> to vector<8x16x128xf32>
    %43 = arith.subf %39, %42 : vector<8x16x128xf32>
    %44 = math.exp %43 : vector<8x16x128xf32>
    %cst_26 = arith.constant dense<0.000000e+00> : vector<8x128xf32>
    %45 = vector.multi_reduction <add>, %44, %cst_26 [1] : vector<8x16x128xf32> to vector<8x128xf32>
    %46 = vector.shape_cast %45 : vector<8x128xf32> to vector<8x1x128xf32>
    %47 = tpu.reciprocal %46 {approx = true} : vector<8x1x128xf32> -> vector<8x1x128xf32>
    %48 = vector.broadcast %47 : vector<8x1x128xf32> to vector<8x16x128xf32>
    %49 = arith.mulf %44, %48 : vector<8x16x128xf32>
    %50 = arith.truncf %49 : vector<8x16x128xf32> to vector<8x16x128xbf16>
    %cst_27 = arith.constant dense<0.000000e+00> : vector<8x8x128xf32>
    %51 = tpu.matmul %36, %50, %cst_27 {dimension_numbers = #tpu.dot_dimension_numbers<[2], [1], [1], [2], [0, 0, 0, 1, 1, 2], [0], [0]>} : vector<8x8x16xbf16>, vector<8x16x128xbf16>, vector<8x8x128xf32> -> vector<8x8x128xf32>
    %52 = vector.shape_cast %51 : vector<8x8x128xf32> to vector<2x32x128xf32>
    %53 = arith.truncf %52 : vector<2x32x128xf32> to vector<2x32x128xbf16>
    %cst_28 = arith.constant dense<0.000000e+00> : vector<2x20x128xf32>
    %54 = tpu.matmul %17, %53, %cst_28 {dimension_numbers = #tpu.dot_dimension_numbers<[2], [1], [1], [2], [0, 0, 0, 1, 1, 2], [0], [0]>} : vector<2x20x32xbf16>, vector<2x32x128xbf16>, vector<2x20x128xf32> -> vector<2x20x128xf32>
    %c0_29 = arith.constant 0 : index
    %c0_30 = arith.constant 0 : index
    %55 = vector.load %arg12[%c0_29, %c0_30] : memref<20x1xf32, #tpu.memory_space<vmem>>, vector<20x1xf32>
    %56 = vector.shape_cast %55 : vector<20x1xf32> to vector<1x20x1xf32>
    %57 = vector.broadcast %56 : vector<1x20x1xf32> to vector<2x20x128xf32>
    %58 = arith.addf %54, %57 : vector<2x20x128xf32>
    %c0_31 = arith.constant 0 : index
    %c0_32 = arith.constant 0 : index
    %c0_33 = arith.constant 0 : index
    %59 = vector.load %arg13[%c0_31, %c0_32, %c0_33] : memref<2x20x128xf32, #tpu.memory_space<vmem>>, vector<2x20x128xf32>
    tpu.vector_store %arg13[%c0_31, %c0_32, %c0_33], %58 {strides = array<i32>} : memref<2x20x128xf32, #tpu.memory_space<vmem>>, vector<2x20x128xf32>,
    return
  }
  func.func @transform_0(%arg0: i32, %arg1: i32) -> (i32, i32, i32) {
    %c0_i32 = arith.constant 0 : i32
    %c0_i32_0 = arith.constant 0 : i32
    %c0_i32_1 = arith.constant 0 : i32
    return %arg0, %c0_i32, %c0_i32_0 : i32, i32, i32
  }
  func.func @transform_1(%arg0: i32, %arg1: i32) -> (i32, i32, i32) {
    %c0_i32 = arith.constant 0 : i32
    %c0_i32_0 = arith.constant 0 : i32
    %c0_i32_1 = arith.constant 0 : i32
    return %arg0, %c0_i32, %c0_i32_0 : i32, i32, i32
  }
  func.func @transform_2(%arg0: i32, %arg1: i32) -> (i32, i32, i32) {
    %c0_i32 = arith.constant 0 : i32
    %c0_i32_0 = arith.constant 0 : i32
    return %arg0, %c0_i32, %arg1 : i32, i32, i32
  }
  func.func @transform_3(%arg0: i32, %arg1: i32) -> (i32, i32) {
    %c0_i32 = arith.constant 0 : i32
    %c0_i32_0 = arith.constant 0 : i32
    %c0_i32_1 = arith.constant 0 : i32
    return %c0_i32, %c0_i32_0 : i32, i32
  }
  func.func @transform_4(%arg0: i32, %arg1: i32) -> (i32, i32) {
    %c0_i32 = arith.constant 0 : i32
    %c0_i32_0 = arith.constant 0 : i32
    %c0_i32_1 = arith.constant 0 : i32
    return %c0_i32, %c0_i32_0 : i32, i32
  }
  func.func @transform_5(%arg0: i32, %arg1: i32) -> (i32, i32) {
    %c0_i32 = arith.constant 0 : i32
    %c0_i32_0 = arith.constant 0 : i32
    %c0_i32_1 = arith.constant 0 : i32
    return %c0_i32, %c0_i32_0 : i32, i32
  }
  func.func @transform_6(%arg0: i32, %arg1: i32) -> (i32, i32) {
    %c0_i32 = arith.constant 0 : i32
    %c0_i32_0 = arith.constant 0 : i32
    %c0_i32_1 = arith.constant 0 : i32
    return %c0_i32, %c0_i32_0 : i32, i32
  }
  func.func @transform_7(%arg0: i32, %arg1: i32) -> (i32, i32) {
    %c0_i32 = arith.constant 0 : i32
    %c0_i32_0 = arith.constant 0 : i32
    %c0_i32_1 = arith.constant 0 : i32
    return %c0_i32, %c0_i32_0 : i32, i32
  }
  func.func @transform_8(%arg0: i32, %arg1: i32) -> (i32, i32) {
    %c0_i32 = arith.constant 0 : i32
    %c0_i32_0 = arith.constant 0 : i32
    %c0_i32_1 = arith.constant 0 : i32
    return %c0_i32, %c0_i32_0 : i32, i32
  }
  func.func @transform_9(%arg0: i32, %arg1: i32) -> (i32, i32) {
    %c0_i32 = arith.constant 0 : i32
    %c0_i32_0 = arith.constant 0 : i32
    %c0_i32_1 = arith.constant 0 : i32
    return %c0_i32, %c0_i32_0 : i32, i32
  }
  func.func @transform_10(%arg0: i32, %arg1: i32) -> (i32, i32) {
    %c0_i32 = arith.constant 0 : i32
    %c0_i32_0 = arith.constant 0 : i32
    %c0_i32_1 = arith.constant 0 : i32
    return %c0_i32, %c0_i32_0 : i32, i32
  }
  func.func @transform_11(%arg0: i32, %arg1: i32) -> (i32, i32, i32) {
    %c0_i32 = arith.constant 0 : i32
    %c0_i32_0 = arith.constant 0 : i32
    return %arg0, %c0_i32, %arg1 : i32, i32, i32
  }
}

</mosaic_0001>

<bundles_post_ra>
// kernel: multihead_attention.1
= control target key start
LH: loop header
LB: loop body
LE: loop exit
PB: predicated region body
PF: predicated region fallthrough
CT: control target
= control target key end

     0   :  { %s2711_s17 = smov 0   ;;  %s2713_s18 = smov 0   ;;  %s3075_s0 = inlined_call_operand.vmem [shape: f32[4,12,16], index: 0, kind: input, shape index: {}]   ;;  %s3076_s1 = inlined_call_operand.vmem [shape: f32[4,10,16], index: 1, kind: input, shape index: {}]   ;;  %s3077_s2 = inlined_call_operand.vmem [shape: f32[4,14,128], index: 2, kind: input, shape index: {}]   ;;  %s3078_s3 = inlined_call_operand.vmem [shape: bf16[32,12], index: 3, kind: input, shape index: {}]   ;;  %s3079_s4 = inlined_call_operand.vmem [shape: f32[32,1], index: 4, kind: input, shape index: {}]   ;;  %s3080_s5 = inlined_call_operand.vmem [shape: bf16[32,10], index: 5, kind: input, shape index: {}]   ;;  %s3081_s6 = inlined_call_operand.vmem [shape: f32[32,1], index: 6, kind: input, shape index: {}]   ;;  %s3082_s7 = inlined_call_operand.vmem [shape: bf16[32,14], index: 7, kind: input, shape index: {}]   ;;  %s3083_s8 = inlined_call_operand.vmem [shape: f32[32,1], index: 8, kind: input, shape index: {}]   ;;  %s3084_s9 = inlined_call_operand.vmem [shape: bf16[20,32], index: 9, kind: input, shape index: {}]   ;;  %s3085_s10 = inlined_call_operand.vmem [shape: f32[20,1], index: 10, kind: input, shape index: {}]   ;;  %s3086_s11 = inlined_call_operand.vmem [shape: f32[4,20,128], index: 11, kind: output, shape index: {}]  }
   0x1   :  { %s2715_s19 = smov 0  }
   0x2 LB: > { %s33_s20 = sadd.s32 1, %s2642_s18  ;;  %p2269_p0 = scmp.ge.s32.totalorder %s2646_s19, 1  ;;  %s2646_s19 = sphi %s2715_s19, %s21_s19   ;;  %s2642_s18 = sphi %s2713_s18, %s3088_s18   ;;  %s2638_s17 = sphi %s2711_s17, %s3087_s17  }
   0x3   : > { %p35_p1 = scmp.ge.s32.totalorder %s33_s20, 2  ;;  %p382_p2 = scmp.lt.s32.totalorder %s2646_s19, 3 }
   0x5   : > { %s3090_s20 = smov (%p35_p1, %s33_s20), 0  ;;  %p383_p3 = pnand %p2269_p0, %p382_p2 }
   0x6   : > { %s2270_s21 = sshll.u32 (!%p383_p3), %s2638_s17, 1 }
   0x7   : > { %386 = sbr.rel (%p383_p3) target bundleno = 1020 (0x3fc), region = 64  ;;  %p443_p4 = scmp.lt.s32.totalorder (!%p383_p3), %s2270_s21, 3 }
   0xc   : > { %v2568_v0 = vld [vmem:[%s3078_s3] sm:$0xff]   ;;  %vm544_vm0 = vcmask 97280   ;;  %s3092_s21 = smov (!%p443_p4, %s2270_s21), 3  ;;  %vm551_vm1 = vcmask 1045504   ;;  %v2648_v5 = vmov 0   ;;  %v2569_v11 = vld [vmem:[%s3078_s3 + $0x8] sm:$0xff]  }
   0xd   : > { %2386 = vmatprep.mubr.msk.bf16.mxu0 %vm544_vm0, %v2568_v0  ;;  %2392 = vmatprep.mubr.msk.bf16.mxu1 %vm544_vm0, %v2568_v0  ;;  %s2323_s24 = sshll.u32 %s3092_s21, 4  ;;  %v510_v1 = vld [vmem:[%s3079_s4] sm:$0xff]  ;;  %vm697_vm2 = vcmask 1044480   ;;  %v511_v22 = vld [vmem:[%s3079_s4 + $0x8] sm:$0xff]  ;;  %v512_v23 = vld [vmem:[%s3079_s4 + $0x10] sm:$0xff]  ;;  %vm690_vm3 = vcmask 80896  }
   0xe   : > { %s447_s27 = scalar_lea.vmem %s3075_s0, %s2323_s24  ;;  %s454_s30 = scalar_lea.vmem %s3076_s1, %s2323_s24  ;;  %2566 = vset.pattern.permute.xlu0 %v2648_v5  ;;  %2567 = vset.pattern.permute.xlu1 %v2648_v5  ;;  %v2570_v25 = vld [vmem:[%s3080_s5] sm:$0xff]   ;;  %vm843_vm4 = vcmask 1046528   ;;  %v513_v30 = vld [vmem:[%s3079_s4 + $0x18] sm:$0xff]  ;;  %v2571_v31 = vld [vmem:[%s3080_s5 + $0x8] sm:$0xff]   ;;  %vm836_vm5 = vcmask 113664   ;;  %v2649_v39 = vmov 0.0  }
   0xf   : > { %s464_s16 = scalar_lea.vmem %s3077_s2, %s2323_s24  ;;  %v477_v2 = vld [vmem:[%s447_s27] sm:$0xff]  ;;  %v478_v3 = vld [vmem:[%s447_s27 + $0x8] sm:$0xf]  ;;  %v479_v4 = vld [vmem:[%s447_s27 + $0x10] sm:$0xff]  ;;  %516 = vperm.xlu0 %2566, %v510_v1   ;;  %526 = vperm.xlu1 %2567, %v512_v23   ;;  %vm2650_vm6 = vmmov 0   ;;  %vm992_vm7 = vcmask 1043456  }
  0x10   : > { %v481_v6 = vpack.c.bf16 %v478_v3, %v477_v2  ;;  %v480_v7 = vld [vmem:[%s447_s27 + $0x18] sm:$0xf]  ;;  %v483_v8 = vld [vmem:[%s454_s30] sm:$0xff]  ;;  %v484_v9 = vld [vmem:[%s454_s30 + $0x8] sm:$0x3]  ;;  %vm988_vm8 = vcmask 64512  }
  0x11   : > { %v482_v10 = vpack.c.bf16 %v480_v7, %v479_v4  ;;  %v487_v12 = vpack.c.bf16 %v484_v9, %v483_v8  ;;  %v485_v13 = vld [vmem:[%s454_s30 + $0x10] sm:$0xff]  ;;  %v486_v14 = vld [vmem:[%s454_s30 + $0x18] sm:$0x3]  ;;  %v489_v17 = vld [vmem:[%s464_s16] sm:$0xff]  ;;  %vm1670_vm9 = vcmask 130048   ;;  %vm2045_vm10 = vcmask 261120  }
  0x12   : > { %2532 = vmatprep.subr.msk.bf16.mxu0 %vm551_vm1, %v481_v6  ;;  %v553_v15 = vsel %vm551_vm1, %v481_v6, 0  ;;  %v488_v16 = vpack.c.bf16 %v486_v14, %v485_v13  ;;  %v490_v18 = vld [vmem:[%s464_s16 + $0x8] sm:$0x3f]  ;;  %v491_v19 = vld [vmem:[%s464_s16 + $0x10] sm:$0xff]  ;;  %v492_v21 = vld [vmem:[%s464_s16 + $0x18] sm:$0x3f] }
  0x13   : > { %2533 = vmatprep.subr.msk.bf16.mxu1 %vm551_vm1, %v482_v10  ;;  %2385 = vmatpush3.bf16.msra.mxu0 %v553_v15  ;;  %v605_v20 = vsel %vm551_vm1, %v482_v10, 0  ;;  %v699_v24 = vsel %vm697_vm2, %v487_v12, 0  ;;  %v493_v27 = vpack.c.bf16 %v490_v18, %v489_v17  ;;  %v494_v28 = vpack.c.bf16 %v492_v21, %v491_v19  ;;  %v802_v29 = vld [vmem:[%s3083_s8] sm:$0xff]  ;;  %v804_v32 = vld [vmem:[%s3083_s8 + $0x10] sm:$0xff]  ;;  %v803_v36 = vld [vmem:[%s3083_s8 + $0x8] sm:$0xff]  ;;  %s2538_s14 = smul.u32 24, %s3092_s21 }
  0x14   : > { %2391 = vmatpush3.bf16.msra.mxu1 %v605_v20  ;;  %2534 = vmatprep.subr.msk.bf16.mxu0 %vm697_vm2, %v487_v12  ;;  %v751_v26 = vsel %vm697_vm2, %v488_v16, 0  ;;  %v2572_v34 = vld [vmem:[%s3082_s7] sm:$0xff]   ;;  %v2573_v37 = vld [vmem:[%s3082_s7 + $0x8] sm:$0xff]   ;;  %v805_v38 = vld [vmem:[%s3083_s8 + $0x18] sm:$0xff] }
  0x15   : > { %2535 = vmatprep.subr.msk.bf16.mxu1 %vm697_vm2, %v488_v16  ;;  %521 = vperm.xlu0 %2566, %v511_v22   ;;  %v845_v33 = vsel %vm843_vm4, %v493_v27, 0  ;;  %v897_v35 = vsel %vm843_vm4, %v494_v28, 0  ;;  %v656_v17 = vld [vmem:[%s3081_s6] sm:$0xff]  ;;  %s474_s17 = scalar_lea.vmem %s3086_s11, %s2538_s14 }
  0x16   : > { %2387 = vmatmul.mubr.msk.bf16.vlgmr.msra.gmra.mxu0 %vm544_vm0, %v2569_v11  ;;  %531 = vperm.xlu1 %2567, %v513_v30   ;;  %v659_v30 = vld [vmem:[%s3081_s6 + $0x18] sm:$0xff] }
  0x17   : > { %2393 = vmatmul.mubr.msk.bf16.vlgmr.msra.gmra.mxu1 %vm544_vm0, %v2569_v11  ;;  %2397 = vmatpush3.bf16.msra.mxu0 %v699_v24 }
  0x18   : > { %2403 = vmatpush3.bf16.msra.mxu1 %v751_v26  ;;  %2398 = vmatprep.mubr.msk.bf16.mxu0 %vm690_vm3, %v2570_v25  ;;  %v658_v26 = vld [vmem:[%s3081_s6 + $0x10] sm:$0xff] }
  0x19   : > { %2404 = vmatprep.mubr.msk.bf16.mxu1 %vm690_vm3, %v2570_v25  ;;  %2536 = vmatprep.subr.msk.bf16.mxu0 %vm843_vm4, %v493_v27 }
  0x1a   : > { %2537 = vmatprep.subr.msk.bf16.mxu1 %vm843_vm4, %v494_v28  ;;  %808 = vperm.xlu0 %2566, %v802_v29  }
  0x1b   : > { %813 = vperm.xlu1 %2567, %v803_v36  }
  0x1e   : > { %2399 = vmatmul.mubr.msk.bf16.vlgmr.msra.gmra.mxu0 %vm690_vm3, %v2571_v31  ;;  %818 = vperm.xlu0 %2566, %v804_v32   ;;  %v2020_v32 = vld [vmem:[%s3085_s10 + $0x8] sm:$0xff] }
  0x1f   : > { %2405 = vmatmul.mubr.msk.bf16.vlgmr.msra.gmra.mxu1 %vm690_vm3, %v2571_v31  ;;  %2409 = vmatpush3.bf16.msra.mxu0 %v845_v33  ;;  %v657_v31 = vld [vmem:[%s3081_s6 + $0x8] sm:$0xff]  ;;  %v2019_v33 = vld [vmem:[%s3085_s10] sm:$0xff] }
  0x20   : > { %2415 = vmatpush3.bf16.msra.mxu1 %v897_v35  ;;  %2410 = vmatprep.mubr.msk.bf16.mxu0 %vm836_vm5, %v2572_v34 }
  0x21   : > { %2416 = vmatprep.mubr.msk.bf16.mxu1 %vm836_vm5, %v2572_v34  ;;  %823 = vperm.xlu1 %2567, %v805_v38   ;;  %v2021_v34 = vld [vmem:[%s3085_s10 + $0x10] sm:$0xf] }
  0x22   : > { %2420 = vmatprep.subr.bf16.mxu0 %v2649_v39  ;;  %2426 = vmatprep.subr.bf16.mxu1 %v2649_v39 }
  0x26   : > { %2411 = vmatmul.mubr.msk.bf16.vlgmr.msra.gmra.mxu0 %vm836_vm5, %v2573_v37 }
  0x27   : > { %2417 = vmatmul.mubr.msk.bf16.vlgmr.msra.gmra.mxu1 %vm836_vm5, %v2573_v37  ;;  %2422 = vmatprep.mubr.msk.bf16.mxu0 %vm2650_vm6, %v2649_v39 }
  0x28   : > { %2428 = vmatprep.mubr.msk.bf16.mxu1 %vm2650_vm6, %v2649_v39 }
  0x8a   : > { %v517_v40 = vpop.permute.xlu0 %516  ;;  %v527_v43 = vpop.permute.xlu1 %526 }
  0x90   : > { %v522_v45 = vpop.permute.xlu0 %521 }
  0x91   : > { %v532_v54 = vpop.permute.xlu1 %531 }
  0x95   : > { %v2811_v56 = vpop.permute.xlu0 %808 }
  0x96   : > { %v2817_v4 = vpop.permute.xlu1 %813 }
  0x99   : > { %v2821_v6 = vpop.permute.xlu0 %818 }
  0x9c   : > { %v2825_v15 = vpop.permute.xlu1 %823 }
  0xd6   : > { %v2388_v41 = vpop.f32.mrf.mxu0 }
  0xd7   : > { %v2394_v42 = vpop.f32.mrf.mxu1  ;;  %v598_v49 = vadd.f32 %v2388_v41, %v527_v43 }
  0xd8   : > { %v589_v44 = vpop.f32.mrf.mxu0  ;;  %v650_v0 = vadd.f32 %v2394_v42, %v527_v43 }
  0xd9   : > { %v590_v46 = vadd.f32 %v589_v44, %v517_v40  ;;  %v641_v47 = vpop.f32.mrf.mxu1  ;;  %v950_v57 = vpack.c.bf16 %v598_v49, %v598_v49 }
  0xda   : > { %v2389_v48 = vpop.f32.mrf.mxu0  ;;  %v642_v58 = vadd.f32 %v641_v47, %v517_v40  ;;  %v954_v8 = vpack.c.bf16 %v650_v0, %v650_v0 }
  0xdb   : > { %v948_v50 = vpack.c.bf16 %v590_v46, %v590_v46  ;;  %v2395_v51 = vpop.f32.mrf.mxu1  ;;  %v601_v59 = vadd.f32 %v2389_v48, %v532_v54 }
  0xdc   : > { %v592_v52 = vpop.f32.mrf.mxu0  ;;  %v952_v1 = vpack.c.bf16 %v642_v58, %v642_v58  ;;  %v653_v9 = vadd.f32 %v2395_v51, %v532_v54 }
  0xdd   : > { %v593_v53 = vadd.f32 %v592_v52, %v522_v45  ;;  %972 = vxpose.xlu0.c.b16.start.end [1/1] (short) (narrow) %v948_v50, 16  ;;  %v644_v61 = vpop.f32.mrf.mxu1  ;;  %v951_v2 = vpack.c.bf16 %v601_v59, %v601_v59 }
  0xde   : > { %v2809_v55 = vpop.f32.mrf.mxu0  ;;  %v645_v3 = vadd.f32 %v644_v61, %v522_v45  ;;  %v955_v18 = vpack.c.bf16 %v653_v9, %v653_v9 }
  0xdf   : > { %v949_v60 = vpack.c.bf16 %v593_v53, %v593_v53  ;;  %v2856_v35 = vpop.f32.mrf.mxu1 }
  0xe0   : > { %v2813_v62 = vpop.f32.mrf.mxu0  ;;  %v953_v10 = vpack.c.bf16 %v645_v3, %v645_v3 }
  0xe1   : > { %1037 = vxpose.xlu1.c.b16.start.end [1/1] (short) (narrow) %v949_v60, 16  ;;  %1100 = vxpose.xlu0.c.b16.start.end [1/1] (short) (narrow) %v950_v57, 16  ;;  %v2858_v36 = vpop.f32.mrf.mxu1 }
  0xe2   : > { %v2815_v63 = vpop.f32.mrf.mxu0 }
  0xe3   : > { %v2860_v37 = vpop.f32.mrf.mxu1 }
  0xe4   : > { %v2819_v5 = vpop.f32.mrf.mxu0 }
  0xe5   : > { %1226 = vxpose.xlu1.c.b16.start.end [1/1] (short) (narrow) %v952_v1, 16  ;;  %1163 = vxpose.xlu0.c.b16.start.end [1/1] (short) (narrow) %v951_v2, 16  ;;  %v2862_v38 = vpop.f32.mrf.mxu1 }
  0xe6   : > { %v2412_v7 = vpop.f32.mrf.mxu0 }
  0xe7   : > { %v890_v11 = vadd.f32 %v2412_v7, %v2821_v6  ;;  %v2418_v40 = vpop.f32.mrf.mxu1 }
  0xe8   : > { %v881_v12 = vpop.f32.mrf.mxu0  ;;  %v942_v50 = vadd.f32 %v2418_v40, %v2821_v6 }
  0xe9   : > { %v966_v13 = vpack.c.bf16 %v890_v11, %v890_v11  ;;  %v882_v14 = vadd.f32 %v881_v12, %v2811_v56  ;;  %1352 = vxpose.xlu1.c.b16.start.end [1/1] (short) (narrow) %v954_v8, 16  ;;  %1289 = vxpose.xlu0.c.b16.start.end [1/1] (short) (narrow) %v953_v10, 16  ;;  %v933_v41 = vpop.f32.mrf.mxu1 }
  0xea   : > { %v2413_v16 = vpop.f32.mrf.mxu0  ;;  %v934_v44 = vadd.f32 %v933_v41, %v2811_v56  ;;  %v970_v54 = vpack.c.bf16 %v942_v50, %v942_v50 }
  0xeb   : > { %v1120_v19 = vsel %vm992_vm7, %v966_v13, 0  ;;  %v964_v20 = vpack.c.bf16 %v882_v14, %v882_v14  ;;  %v893_v21 = vadd.f32 %v2413_v16, %v2825_v15  ;;  %v2419_v42 = vpop.f32.mrf.mxu1 }
  0xec   : > { %v884_v22 = vpop.f32.mrf.mxu0  ;;  %v968_v48 = vpack.c.bf16 %v934_v44, %v934_v44  ;;  %v945_v56 = vadd.f32 %v2419_v42, %v2825_v15  ;;  %v1372_v59 = vsel %vm992_vm7, %v970_v54, 0 }
  0xed   : > { %v994_v23 = vsel %vm992_vm7, %v964_v20, 0  ;;  %v967_v24 = vpack.c.bf16 %v893_v21, %v893_v21  ;;  %v885_v25 = vadd.f32 %v884_v22, %v2817_v4  ;;  %662 = vperm.xlu1 %2567, %v656_v17   ;;  %1415 = vxpose.xlu0.c.b16.start.end [1/1] (short) (narrow) %v955_v18, 16  ;;  %v936_v45 = vpop.f32.mrf.mxu1 }
  0xee   : > { %2421 = vmatpush3.bf16.msra.mxu0 %v994_v23  ;;  %v937_v49 = vadd.f32 %v936_v45, %v2817_v4  ;;  %v1246_v51 = vsel %vm992_vm7, %v968_v48, 0  ;;  %v971_v60 = vpack.c.bf16 %v945_v56, %v945_v56 }
  0xef   : > { %v1183_v27 = vsel %vm992_vm7, %v967_v24, 0  ;;  %v965_v28 = vpack.c.bf16 %v885_v25, %v885_v25  ;;  %2432 = vmatprep.subr.bf16.mxu0 %v2649_v39 }
  0xf0   : > { %v969_v52 = vpack.c.bf16 %v937_v49, %v937_v49  ;;  %v1435_v0 = vsel %vm992_vm7, %v971_v60, 0 }
  0xf1   : > { %v1057_v29 = vsel %vm992_vm7, %v965_v28, 0  ;;  %672 = vperm.xlu1 %2567, %v658_v26  }
  0xf2   : > { %2427 = vmatpush3.bf16.msra.mxu1 %v1057_v29  ;;  %v1309_v57 = vsel %vm992_vm7, %v969_v52, 0 }
  0xf3   : > { %2438 = vmatprep.subr.bf16.mxu1 %v2649_v39 }
  0xf5   : > { %677 = vperm.xlu1 %2567, %v659_v30  }
  0xf6   : > { %667 = vperm.xlu0 %2566, %v657_v31  }
  0xf9   : > { %2029 = vperm.xlu1 %2567, %v2020_v32  }
  0xfa   : > { %2024 = vperm.xlu0 %2566, %v2019_v33  }
  0xfe   : > { %2034 = vperm.xlu0 %2566, %v2021_v34  }
 0x13f   : > { %v980_v43 = vpop.trf.xlu0 }
 0x140   : > { %2423 = vmatmul.mubr.msk.bf16.vlgmr.msra.gmra.mxu0 %vm988_vm8, %v980_v43 }
 0x141   : > { %2433 = vmatpush3.bf16.msra.mxu0 %v1120_v19  ;;  %2434 = vmatprep.mubr.msk.bf16.mxu0 %vm2650_vm6, %v2649_v39 }
 0x142   : > { %2444 = vmatprep.subr.bf16.mxu0 %v2649_v39 }
 0x143   : > { %v1045_v46 = vpop.trf.xlu1  ;;  %v1108_v47 = vpop.trf.xlu0 }
 0x144   : > { %2429 = vmatmul.mubr.msk.bf16.vlgmr.msra.gmra.mxu1 %vm988_vm8, %v1045_v46 }
 0x145   : > { %2439 = vmatpush3.bf16.msra.mxu1 %v1183_v27  ;;  %2440 = vmatprep.mubr.msk.bf16.mxu1 %vm2650_vm6, %v2649_v39 }
 0x146   : > { %2450 = vmatprep.subr.bf16.mxu1 %v2649_v39 }
 0x147   : > { %v1171_v53 = vpop.trf.xlu0  ;;  %v1234_v58 = vpop.trf.xlu1 }
 0x148   : > { %2435 = vmatmul.mubr.msk.bf16.vlgmr.msra.gmra.mxu0 %vm988_vm8, %v1108_v47 }
 0x149   : > { %2445 = vmatpush3.bf16.msra.mxu0 %v1246_v51  ;;  %2446 = vmatprep.mubr.msk.bf16.mxu0 %vm2650_vm6, %v2649_v39 }
 0x14a   : > { %2456 = vmatprep.subr.bf16.mxu0 %v2649_v39 }
 0x14b   : > { %v1297_v61 = vpop.trf.xlu0  ;;  %v1360_v1 = vpop.trf.xlu1 }
 0x14c   : > { %2441 = vmatmul.mubr.msk.bf16.vlgmr.msra.gmra.mxu1 %vm988_vm8, %v1171_v53 }
 0x14d   : > { %2451 = vmatpush3.bf16.msra.mxu1 %v1309_v57  ;;  %2452 = vmatprep.mubr.msk.bf16.mxu1 %vm2650_vm6, %v2649_v39 }
 0x14e   : > { %2462 = vmatprep.subr.bf16.mxu1 %v2649_v39 }
 0x14f   : > { %v1423_v2 = vpop.trf.xlu0 }
 0x150   : > { %2447 = vmatmul.mubr.msk.bf16.vlgmr.msra.gmra.mxu0 %vm988_vm8, %v1234_v58 }
 0x151   : > { %2457 = vmatpush3.bf16.msra.mxu0 %v1372_v59  ;;  %2458 = vmatprep.mubr.msk.bf16.mxu0 %vm2650_vm6, %v2649_v39 }
 0x152   : > { %2468 = vmatprep.subr.bf16.mxu0 %v2649_v39 }
 0x154   : > { %2453 = vmatmul.mubr.msk.bf16.vlgmr.msra.gmra.mxu1 %vm988_vm8, %v1297_v61 }
 0x155   : > { %2463 = vmatpush3.bf16.msra.mxu1 %v1435_v0  ;;  %2464 = vmatprep.mubr.msk.bf16.mxu1 %vm2650_vm6, %v2649_v39 }
 0x156   : > { %2474 = vmatprep.subr.bf16.mxu1 %v2649_v39 }
 0x158   : > { %2459 = vmatmul.mubr.msk.bf16.vlgmr.msra.gmra.mxu0 %vm988_vm8, %v1360_v1 }
 0x159   : > { %2470 = vmatprep.mubr.msk.bf16.mxu0 %vm2650_vm6, %v2649_v39 }
 0x15c   : > { %2465 = vmatmul.mubr.msk.bf16.vlgmr.msra.gmra.mxu1 %vm988_vm8, %v1423_v2 }
 0x15d   : > { %2476 = vmatprep.mubr.msk.bf16.mxu1 %vm2650_vm6, %v2649_v39 }
 0x200   : > { %v1030_v3 = vpop.f32.mrf.mxu0 }
 0x202   : > { %v2424_v4 = vpop.f32.mrf.mxu0 }
 0x204   : > { %v1033_v6 = vpop.f32.mrf.mxu0  ;;  %v1093_v7 = vpop.f32.mrf.mxu1 }
 0x205   : > { %v1478_v8 = vmax.f32 %v1030_v3, %v1033_v6 }
 0x206   : > { %v2425_v9 = vpop.f32.mrf.mxu0  ;;  %v2430_v10 = vpop.f32.mrf.mxu1 }
 0x207   : > { %v1479_v11 = vrot.slane %v1478_v8, 4 }
 0x208   : > { %v1096_v12 = vpop.f32.mrf.mxu1  ;;  %v2902_v13 = vpop.f32.mrf.mxu0 }
 0x209   : > { %v1480_v14 = vmax.f32 %v1478_v8, %v1479_v11  ;;  %v1485_v15 = vmax.f32 %v1093_v7, %v1096_v12 }
 0x20a   : > { %v2431_v16 = vpop.f32.mrf.mxu1  ;;  %v2436_v17 = vpop.f32.mrf.mxu0 }
 0x20b   : > { %v1481_v18 = vrot.slane %v1480_v14, 2  ;;  %v1486_v19 = vrot.slane %v1485_v15, 4 }
 0x20c   : > { %v1159_v20 = vpop.f32.mrf.mxu0  ;;  %v2904_v21 = vpop.f32.mrf.mxu1 }
 0x20d   : > { %v1482_v22 = vmax.f32 %v1480_v14, %v1481_v18  ;;  %v1487_v23 = vmax.f32 %v1485_v15, %v1486_v19  ;;  %v1492_v24 = vmax.f32 %v2902_v13, %v1159_v20 }
 0x20e   : > { %v2437_v25 = vpop.f32.mrf.mxu0  ;;  %v2442_v26 = vpop.f32.mrf.mxu1 }
 0x20f   : > { %v1483_v27 = vrot.slane %v1482_v22, 1  ;;  %v1488_v28 = vrot.slane %v1487_v23, 2  ;;  %v1493_v29 = vrot.slane %v1492_v24, 4 }
 0x210   : > { %v2907_v30 = vpop.f32.mrf.mxu1  ;;  %v2909_v31 = vpop.f32.mrf.mxu0 }
 0x211   : > { %v1484_v32 = vmax.f32 %v1482_v22, %v1483_v27  ;;  %v1489_v33 = vmax.f32 %v1487_v23, %v1488_v28  ;;  %v1494_v34 = vmax.f32 %v1492_v24, %v1493_v29  ;;  %v1499_v40 = vmax.f32 %v2904_v21, %v2907_v30 }
 0x212   : > { %v2443_v41 = vpop.f32.mrf.mxu1  ;;  %v2448_v42 = vpop.f32.mrf.mxu0 }
 0x213   : > { %v1534_v43 = vsub.f32 %v1030_v3, %v1484_v32  ;;  %v1535_v44 = vsub.f32 %v1033_v6, %v1484_v32  ;;  %v1490_v45 = vrot.slane %v1489_v33, 1  ;;  %v1495_v46 = vrot.slane %v1494_v34, 2 }
 0x214   : > { %v1500_v47 = vrot.slane %v1499_v40, 4  ;;  %v2913_v48 = vpop.f32.mrf.mxu0  ;;  %v2915_v49 = vpop.f32.mrf.mxu1 }
 0x215   : > { %v1550_v50 = vmul.f32 1.442695, %v1534_v43  ;;  %v1552_v51 = vmul.f32 1.442695, %v1535_v44  ;;  %v1491_v52 = vmax.f32 %v1489_v33, %v1490_v45  ;;  %v1496_v53 = vmax.f32 %v1494_v34, %v1495_v46 }
 0x216   : > { %v1501_v54 = vmax.f32 %v1499_v40, %v1500_v47  ;;  %v1506_v56 = vmax.f32 %v2909_v31, %v2913_v48  ;;  %v2449_v57 = vpop.f32.mrf.mxu0  ;;  %v2454_v58 = vpop.f32.mrf.mxu1 }
 0x217   : > { %2576 = vpow2.f32 %v1550_v50  ;;  %v1536_v59 = vsub.f32 %v1093_v7, %v1491_v52  ;;  %v1537_v60 = vsub.f32 %v1096_v12, %v1491_v52  ;;  %v1497_v61 = vrot.slane %v1496_v53, 1 }
 0x218   : > { %2578 = vpow2.f32 %v1552_v51  ;;  %v1502_v0 = vrot.slane %v1501_v54, 2  ;;  %v1507_v1 = vrot.slane %v1506_v56, 4  ;;  %v2919_v2 = vpop.f32.mrf.mxu1  ;;  %v2921_v3 = vpop.f32.mrf.mxu0 }
 0x219   : > { %v1554_v4 = vmul.f32 1.442695, %v1536_v59  ;;  %v1556_v6 = vmul.f32 1.442695, %v1537_v60  ;;  %v1498_v8 = vmax.f32 %v1496_v53, %v1497_v61  ;;  %v1513_v9 = vmax.f32 %v2915_v49, %v2919_v2 }
 0x21a   : > { %v1503_v10 = vmax.f32 %v1501_v54, %v1502_v0  ;;  %v1508_v11 = vmax.f32 %v1506_v56, %v1507_v1  ;;  %v2455_v14 = vpop.f32.mrf.mxu1  ;;  %v2460_v15 = vpop.f32.mrf.mxu0 }
 0x21b   : > { %2580 = vpow2.f32 %v1554_v4  ;;  %v1538_v7 = vsub.f32 %v2902_v13, %v1498_v8  ;;  %v1539_v12 = vsub.f32 %v1159_v20, %v1498_v8  ;;  %v1514_v16 = vrot.slane %v1513_v9, 4 }
 0x21c   : > { %2582 = vpow2.f32 %v1556_v6  ;;  %v1504_v17 = vrot.slane %v1503_v10, 1  ;;  %v1509_v18 = vrot.slane %v1508_v11, 2  ;;  %v2926_v19 = vpop.f32.mrf.mxu0  ;;  %v2928_v22 = vpop.f32.mrf.mxu1 }
 0x21d   : > { %v1558_v23 = vmul.f32 1.442695, %v1538_v7  ;;  %v1560_v24 = vmul.f32 1.442695, %v1539_v12  ;;  %v1515_v25 = vmax.f32 %v1513_v9, %v1514_v16  ;;  %v1520_v26 = vmax.f32 %v2921_v3, %v2926_v19 }
 0x21e   : > { %v1505_v27 = vmax.f32 %v1503_v10, %v1504_v17  ;;  %v1510_v28 = vmax.f32 %v1508_v11, %v1509_v18  ;;  %v2461_v29 = vpop.f32.mrf.mxu0  ;;  %v2466_v32 = vpop.f32.mrf.mxu1 }
 0x21f   : > { %2584 = vpow2.f32 %v1558_v23  ;;  %v1516_v13 = vrot.slane %v1515_v25, 2  ;;  %v1521_v20 = vrot.slane %v1520_v26, 4 }
 0x220   : > { %2586 = vpow2.f32 %v1560_v24  ;;  %v1540_v33 = vsub.f32 %v2904_v21, %v1505_v27  ;;  %v1541_v34 = vsub.f32 %v2907_v30, %v1505_v27  ;;  %v1511_v40 = vrot.slane %v1510_v28, 1  ;;  %v2934_v41 = vpop.f32.mrf.mxu1 }
 0x221   : > { %v1517_v42 = vmax.f32 %v1515_v25, %v1516_v13  ;;  %v1522_v43 = vmax.f32 %v1520_v26, %v1521_v20  ;;  %v1527_v44 = vmax.f32 %v2928_v22, %v2934_v41 }
 0x222   : > { %v1562_v45 = vmul.f32 1.442695, %v1540_v33  ;;  %v1564_v46 = vmul.f32 1.442695, %v1541_v34  ;;  %v1512_v47 = vmax.f32 %v1510_v28, %v1511_v40  ;;  %v2467_v50 = vpop.f32.mrf.mxu1 }
 0x223   : > { %v1518_v51 = vrot.slane %v1517_v42, 1  ;;  %v1523_v52 = vrot.slane %v1522_v43, 2  ;;  %v1528_v53 = vrot.slane %v1527_v44, 4 }
 0x224   : > { %v2938_v54 = vpop.eup %2576  ;;  %2588 = vpow2.f32 %v1562_v45  ;;  %v1542_v21 = vsub.f32 %v2909_v31, %v1512_v47  ;;  %v1543_v30 = vsub.f32 %v2913_v48, %v1512_v47 }
 0x225   : > { %v2942_v56 = vpop.eup %2578  ;;  %2590 = vpow2.f32 %v1564_v46  ;;  %v1519_v57 = vmax.f32 %v1517_v42, %v1518_v51  ;;  %v1524_v58 = vmax.f32 %v1522_v43, %v1523_v52  ;;  %v1529_v59 = vmax.f32 %v1527_v44, %v1528_v53 }
 0x226   : > { %v1582_v60 = vadd.f32 %v2942_v56, %v2938_v54  ;;  %v1566_v61 = vmul.f32 1.442695, %v1542_v21  ;;  %v1568_v0 = vmul.f32 1.442695, %v1543_v30 }
 0x227   : > { %v1544_v1 = vsub.f32 %v2915_v49, %v1519_v57  ;;  %v1545_v4 = vsub.f32 %v2919_v2, %v1519_v57  ;;  %v1525_v6 = vrot.slane %v1524_v58, 1  ;;  %v1530_v8 = vrot.slane %v1529_v59, 2 }
 0x228   : > { %v2948_v31 = vpop.eup %2580  ;;  %v1583_v48 = vrot.slane %v1582_v60, 4  ;;  %2592 = vpow2.f32 %v1566_v61 }
 0x229   : > { %v2950_v9 = vpop.eup %2582  ;;  %2594 = vpow2.f32 %v1568_v0  ;;  %v1570_v10 = vmul.f32 1.442695, %v1544_v1  ;;  %v1572_v11 = vmul.f32 1.442695, %v1545_v4  ;;  %v1526_v14 = vmax.f32 %v1524_v58, %v1525_v6 }
 0x22a   : > { %v1584_v15 = vadd.f32 %v1583_v48, %v1582_v60  ;;  %v1589_v7 = vadd.f32 %v2950_v9, %v2948_v31  ;;  %v1531_v12 = vmax.f32 %v1529_v59, %v1530_v8 }
 0x22b   : > { %2596 = vpow2.f32 %v1570_v10  ;;  %v1546_v49 = vsub.f32 %v2921_v3, %v1526_v14  ;;  %v1547_v2 = vsub.f32 %v2926_v19, %v1526_v14 }
 0x22c   : > { %v2956_v16 = vpop.eup %2584  ;;  %v1585_v17 = vrot.slane %v1584_v15, 2  ;;  %v1590_v18 = vrot.slane %v1589_v7, 4  ;;  %2598 = vpow2.f32 %v1572_v11  ;;  %v1532_v23 = vrot.slane %v1531_v12, 1 }
 0x22d   : > { %v2958_v24 = vpop.eup %2586  ;;  %v1574_v25 = vmul.f32 1.442695, %v1546_v49  ;;  %v1576_v26 = vmul.f32 1.442695, %v1547_v2 }
 0x22e   : > { %v1586_v27 = vadd.f32 %v1585_v17, %v1584_v15  ;;  %v1591_v28 = vadd.f32 %v1590_v18, %v1589_v7  ;;  %v1596_v29 = vadd.f32 %v2958_v24, %v2956_v16  ;;  %v1533_v32 = vmax.f32 %v1531_v12, %v1532_v23  ;;  %v2988_v17 = vpop.permute.xlu1 %662 }
 0x22f   : > { %2600 = vpow2.f32 %v1574_v25 }
 0x230   : > { %v1587_v3 = vrot.slane %v1586_v27, 1  ;;  %v1592_v13 = vrot.slane %v1591_v28, 2  ;;  %v1597_v19 = vrot.slane %v1596_v29, 4  ;;  %2602 = vpow2.f32 %v1576_v26 }
 0x231   : > { %v2962_v20 = vpop.eup %2588  ;;  %v1548_v33 = vsub.f32 %v2928_v22, %v1533_v32  ;;  %v1549_v34 = vsub.f32 %v2934_v41, %v1533_v32 }
 0x232   : > { %v2966_v40 = vpop.eup %2590  ;;  %v1588_v42 = vadd.f32 %v1587_v3, %v1586_v27  ;;  %v1593_v43 = vadd.f32 %v1592_v13, %v1591_v28  ;;  %v1598_v44 = vadd.f32 %v1597_v19, %v1596_v29  ;;  %v736_v19 = vadd.f32 %v2813_v62, %v2988_v17 }
 0x233   : > { %v1603_v45 = vadd.f32 %v2966_v40, %v2962_v20  ;;  %v1578_v46 = vmul.f32 1.442695, %v1548_v33  ;;  %v1580_v47 = vmul.f32 1.442695, %v1549_v34 }
 0x234   : > { %2604 = vrcp.f32 %v1588_v42  ;;  %v1594_v50 = vrot.slane %v1593_v43, 1  ;;  %v1599_v51 = vrot.slane %v1598_v44, 2 }
 0x235   : > { %v2970_v52 = vpop.eup %2592  ;;  %v1604_v53 = vrot.slane %v1603_v45, 4  ;;  %2606 = vpow2.f32 %v1578_v46  ;;  %v668_v46 = vpop.permute.xlu0 %667 }
 0x236   : > { %v2972_v22 = vpop.eup %2594  ;;  %v1595_v41 = vadd.f32 %v1594_v50, %v1593_v43  ;;  %v1600_v21 = vadd.f32 %v1599_v51, %v1598_v44  ;;  %2608 = vpow2.f32 %v1580_v47  ;;  %v956_v51 = vpack.c.bf16 %v736_v19, %v736_v19 }
 0x237   : > { %v1605_v30 = vadd.f32 %v1604_v53, %v1603_v45  ;;  %v1610_v57 = vadd.f32 %v2972_v22, %v2970_v52  ;;  %v3001_v53 = vpop.permute.xlu1 %672 }
 0x238   : > { %v2976_v58 = vpop.eup %2596  ;;  %2610 = vrcp.f32 %v1595_v41  ;;  %v1601_v59 = vrot.slane %v1600_v21, 1  ;;  %v739_v41 = vadd.f32 %v2819_v5, %v668_v46 }
 0x239   : > { %v2978_v60 = vpop.eup %2598  ;;  %v1606_v61 = vrot.slane %v1605_v30, 2  ;;  %v1611_v0 = vrot.slane %v1610_v57, 4 }
 0x23a   : > { %v1602_v1 = vadd.f32 %v1601_v59, %v1600_v21  ;;  %v1617_v4 = vadd.f32 %v2978_v60, %v2976_v58  ;;  %v957_v5 = vpack.c.bf16 %v739_v41, %v739_v41 }
 0x23b   : > { %v1607_v6 = vadd.f32 %v1606_v61, %v1605_v30  ;;  %v1612_v8 = vadd.f32 %v1611_v0, %v1610_v57 }
 0x23c   : > { %v2982_v48 = vpop.eup %2600  ;;  %2612 = vrcp.f32 %v1602_v1  ;;  %v1618_v10 = vrot.slane %v1617_v4, 4 }
 0x23d   : > { %v2984_v11 = vpop.eup %2602  ;;  %v1608_v14 = vrot.slane %v1607_v6, 1  ;;  %v1613_v15 = vrot.slane %v1612_v8, 2 }
 0x23e   : > { %v1619_v7 = vadd.f32 %v1618_v10, %v1617_v4  ;;  %v1624_v12 = vadd.f32 %v2984_v11, %v2982_v48 }
 0x23f   : > { %v1609_v49 = vadd.f32 %v1608_v14, %v1607_v6  ;;  %v1614_v2 = vadd.f32 %v1613_v15, %v1612_v8  ;;  %v678_v8 = vpop.permute.xlu1 %677 }
 0x240   : > { %v1620_v18 = vrot.slane %v1619_v7, 2  ;;  %v1625_v23 = vrot.slane %v1624_v12, 4  ;;  %v799_v19 = vadd.f32 %v2860_v37, %v678_v8 }
 0x241   : > { %v2605_v25 = vpop.eup %2604  ;;  %2614 = vrcp.f32 %v1609_v49  ;;  %v1615_v26 = vrot.slane %v1614_v2, 1 }
 0x242   : > { %v2990_v27 = vpop.eup %2606  ;;  %v1621_v28 = vadd.f32 %v1620_v18, %v1619_v7  ;;  %v1626_v29 = vadd.f32 %v1625_v23, %v1624_v12  ;;  %v1646_v32 = vmul.f32 %v2605_v25, %v2938_v54  ;;  %v1647_v3 = vmul.f32 %v2605_v25, %v2942_v56 }
 0x243   : > { %v2994_v13 = vpop.eup %2608  ;;  %v1616_v33 = vadd.f32 %v1615_v26, %v1614_v2  ;;  %v788_v2 = vadd.f32 %v2858_v36, %v2988_v17 }
 0x244   : > { %v1622_v34 = vrot.slane %v1621_v28, 1  ;;  %v1627_v42 = vrot.slane %v1626_v29, 2  ;;  %v1631_v43 = vadd.f32 %v2994_v13, %v2990_v27  ;;  %v1662_v44 = vpack.c.bf16 %v1647_v3, %v1646_v32 }
 0x245   : > { %v2611_v45 = vpop.eup %2610  ;;  %2616 = vrcp.f32 %v1616_v33 }
 0x246   : > { %v1623_v47 = vadd.f32 %v1622_v34, %v1621_v28  ;;  %v1628_v54 = vadd.f32 %v1627_v42, %v1626_v29  ;;  %v1632_v50 = vrot.slane %v1631_v43, 4  ;;  %2469 = vmatpush3.bf16.msra.mxu0 %v1662_v44  ;;  %v1648_v56 = vmul.f32 %v2611_v45, %v2948_v31  ;;  %v2574_v34 = vld [vmem:[%s3084_s9] sm:$0xff]  }
 0x247   : > { %v1649_v62 = vmul.f32 %v2611_v45, %v2950_v9  ;;  %2480 = vmatprep.subr.bf16.mxu0 %v2649_v39  ;;  %v744_v9 = vadd.f32 %v2809_v55, %v3001_v53  ;;  %v747_v55 = vadd.f32 %v2815_v63, %v678_v8 }
 0x248   : > { %2618 = vrcp.f32 %v1623_v47  ;;  %v1629_v21 = vrot.slane %v1628_v54, 1  ;;  %v1633_v30 = vadd.f32 %v1632_v50, %v1631_v43 }
 0x249   : > { %v2613_v57 = vpop.eup %2612  ;;  %2471 = vmatmul.mubr.msk.bf16.vlgmr.msra.gmra.mxu0 %vm1670_vm9, %v956_v51  ;;  %v1663_v59 = vpack.c.bf16 %v1649_v62, %v1648_v56  ;;  %v959_v18 = vpack.c.bf16 %v747_v55, %v747_v55 }
 0x24a   : > { %v1630_v61 = vadd.f32 %v1629_v21, %v1628_v54  ;;  %v1634_v0 = vrot.slane %v1633_v30, 2  ;;  %v1650_v31 = vmul.f32 %v2613_v57, %v2956_v16  ;;  %v1651_v1 = vmul.f32 %v2613_v57, %v2958_v24  ;;  %2482 = vmatprep.mubr.msk.bf16.mxu0 %vm2650_vm6, %v2649_v39 }
 0x24b   : > { %2475 = vmatpush3.bf16.msra.mxu1 %v1663_v59  ;;  %v958_v16 = vpack.c.bf16 %v744_v9, %v744_v9  ;;  %v2575_v59 = vld [vmem:[%s3084_s9 + $0x8] ss:$0 sps:$4 sm:$0x33]  }
 0x24c   : > { %2620 = vrcp.f32 %v1630_v61  ;;  %v1635_v4 = vadd.f32 %v1634_v0, %v1633_v30  ;;  %v1664_v6 = vpack.c.bf16 %v1651_v1, %v1650_v31  ;;  %2486 = vmatprep.subr.bf16.mxu1 %v2649_v39 }
 0x24e   : > { %v2615_v10 = vpop.eup %2614  ;;  %v1636_v14 = vrot.slane %v1635_v4, 1  ;;  %2477 = vmatmul.mubr.msk.bf16.vlgmr.msra.gmra.mxu1 %vm1670_vm9, %v957_v5  ;;  %2481 = vmatpush3.bf16.msra.mxu0 %v1664_v6 }
 0x24f   : > { %v1652_v24 = vmul.f32 %v2615_v10, %v2962_v20  ;;  %v1653_v15 = vmul.f32 %v2615_v10, %v2966_v40  ;;  %2488 = vmatprep.mubr.msk.bf16.mxu1 %vm2650_vm6, %v2649_v39  ;;  %2492 = vmatprep.subr.bf16.mxu0 %v2649_v39 }
 0x250   : > { %v1637_v7 = vadd.f32 %v1636_v14, %v1635_v4 }
 0x251   : > { %2483 = vmatmul.mubr.msk.bf16.vlgmr.msra.gmra.mxu0 %vm1670_vm9, %v958_v16  ;;  %v1665_v12 = vpack.c.bf16 %v1653_v15, %v1652_v24 }
 0x252   : > { %v2617_v49 = vpop.eup %2616  ;;  %2622 = vrcp.f32 %v1637_v7  ;;  %2494 = vmatprep.mubr.msk.bf16.mxu0 %vm2650_vm6, %v2649_v39 }
 0x253   : > { %2487 = vmatpush3.bf16.msra.mxu1 %v1665_v12  ;;  %v1654_v20 = vmul.f32 %v2617_v49, %v2970_v52  ;;  %v1655_v40 = vmul.f32 %v2617_v49, %v2972_v22  ;;  %v960_v52 = vpack.c.bf16 %v788_v2, %v788_v2  ;;  %v791_v22 = vadd.f32 %v2862_v38, %v668_v46  ;;  %v2025_v12 = vpop.permute.xlu0 %2024 }
 0x254   : > { %2498 = vmatprep.subr.bf16.mxu1 %v2649_v39 }
 0x255   : > { %v2619_v63 = vpop.eup %2618  ;;  %v1666_v23 = vpack.c.bf16 %v1655_v40, %v1654_v20  ;;  %v961_v38 = vpack.c.bf16 %v791_v22, %v791_v22 }
 0x256   : > { %2489 = vmatmul.mubr.msk.bf16.vlgmr.msra.gmra.mxu1 %vm1670_vm9, %v959_v18  ;;  %v1656_v25 = vmul.f32 %v2619_v63, %v2976_v58  ;;  %v1657_v26 = vmul.f32 %v2619_v63, %v2978_v60  ;;  %v796_v60 = vadd.f32 %v2856_v35, %v3001_v53  ;;  %v963_v35 = vpack.c.bf16 %v799_v19, %v799_v19 }
 0x257   : > { %2493 = vmatpush3.bf16.msra.mxu0 %v1666_v23  ;;  %2500 = vmatprep.mubr.msk.bf16.mxu1 %vm2650_vm6, %v2649_v39  ;;  %v2035_v49 = vpop.permute.xlu0 %2034  ;;  %v2030_v23 = vpop.permute.xlu1 %2029 }
 0x258   : > { %v1667_v28 = vpack.c.bf16 %v1657_v26, %v1656_v25  ;;  %2504 = vmatprep.subr.bf16.mxu0 %v2649_v39 }
 0x259   : > { %v2621_v36 = vpop.eup %2620 }
 0x25a   : > { %2495 = vmatmul.mubr.msk.bf16.vlgmr.msra.gmra.mxu0 %vm1670_vm9, %v960_v52  ;;  %2499 = vmatpush3.bf16.msra.mxu1 %v1667_v28  ;;  %v1658_v17 = vmul.f32 %v2621_v36, %v2982_v48  ;;  %v1659_v58 = vmul.f32 %v2621_v36, %v2984_v11  ;;  %v962_v48 = vpack.c.bf16 %v796_v60, %v796_v60 }
 0x25b   : > { %2506 = vmatprep.mubr.msk.bf16.mxu0 %vm2650_vm6, %v2649_v39  ;;  %2510 = vmatprep.subr.bf16.mxu1 %v2649_v39 }
 0x25c   : > { %v1668_v29 = vpack.c.bf16 %v1659_v58, %v1658_v17 }
 0x25e   : > { %2501 = vmatmul.mubr.msk.bf16.vlgmr.msra.gmra.mxu1 %vm1670_vm9, %v961_v38  ;;  %2505 = vmatpush3.bf16.msra.mxu0 %v1668_v29 }
 0x25f   : > { %v2623_v32 = vpop.eup %2622  ;;  %2512 = vmatprep.mubr.msk.bf16.mxu1 %vm2650_vm6, %v2649_v39 }
 0x260   : > { %v1660_v11 = vmul.f32 %v2623_v32, %v2990_v27  ;;  %v1661_v3 = vmul.f32 %v2623_v32, %v2994_v13 }
 0x262   : > { %2507 = vmatmul.mubr.msk.bf16.vlgmr.msra.gmra.mxu0 %vm1670_vm9, %v962_v48  ;;  %v1669_v33 = vpack.c.bf16 %v1661_v3, %v1660_v11 }
 0x263   : > { %2520 = vmatprep.mubr.msk.bf16.mxu0 %vm2045_vm10, %v2574_v34 }
 0x264   : > { %2511 = vmatpush3.bf16.msra.mxu1 %v1669_v33 }
 0x267   : > { %2513 = vmatmul.mubr.msk.bf16.vlgmr.msra.gmra.mxu1 %vm1670_vm9, %v963_v35 }
 0x268   : > { %2528 = vmatprep.mubr.msk.bf16.mxu1 %vm2045_vm10, %v2574_v34 }
 0x309   : > { %v1708_v39 = vpop.f32.mrf.mxu0 }
 0x30b   : > { %v2472_v27 = vpop.f32.mrf.mxu0 }
 0x30d   : > { %v1711_v13 = vpop.f32.mrf.mxu0 }
 0x30e   : > { %v1751_v37 = vpop.f32.mrf.mxu1 }
 0x30f   : > { %v2473_v42 = vpop.f32.mrf.mxu0  ;;  %v2015_v62 = vpack.c.bf16 %v1751_v37, %v1708_v39 }
 0x310   : > { %v2478_v43 = vpop.f32.mrf.mxu1 }
 0x311   : > { %v1794_v44 = vpop.f32.mrf.mxu0 }
 0x312   : > { %v1754_v45 = vpop.f32.mrf.mxu1 }
 0x313   : > { %v2484_v46 = vpop.f32.mrf.mxu0 }
 0x314   : > { %v2479_v47 = vpop.f32.mrf.mxu1 }
 0x315   : > { %v1797_v54 = vpop.f32.mrf.mxu0 }
 0x316   : > { %v1837_v50 = vpop.f32.mrf.mxu1 }
 0x317   : > { %v2016_v56 = vpack.c.bf16 %v1837_v50, %v1794_v44  ;;  %v2485_v51 = vpop.f32.mrf.mxu0 }
 0x318   : > { %v2490_v53 = vpop.f32.mrf.mxu1 }
 0x319   : > { %2516 = vmatprep.subr.bf16.mxu0 %v2016_v56 }
 0x31a   : > { %v1840_v41 = vpop.f32.mrf.mxu1  ;;  %v1880_v21 = vpop.f32.mrf.mxu0  ;;  %2517 = vmatpush3.bf16.msra.mxu0 %v2016_v56 }
 0x31b   : > { %2518 = vmatprep.subr.bf16.mxu0 %v2015_v62 }
 0x31c   : > { %v2491_v30 = vpop.f32.mrf.mxu1  ;;  %v2496_v57 = vpop.f32.mrf.mxu0 }
 0x31e   : > { %v1883_v61 = vpop.f32.mrf.mxu0  ;;  %v1923_v0 = vpop.f32.mrf.mxu1  ;;  %2519 = vmatpush3.bf16.msra.mxu0 %v2015_v62 }
 0x31f   : > { %v2017_v15 = vpack.c.bf16 %v1923_v0, %v1880_v21 }
 0x320   : > { %v2497_v31 = vpop.f32.mrf.mxu0  ;;  %v2502_v1 = vpop.f32.mrf.mxu1 }
 0x321   : > { %2521 = vmatmul.mubr.msk.bf16.vlgmr.msra.gmra.mxu0 %vm2045_vm10, %v2575_v59 }
 0x322   : > { %v1926_v9 = vpop.f32.mrf.mxu1  ;;  %v1966_v5 = vpop.f32.mrf.mxu0 }
 0x324   : > { %v2503_v4 = vpop.f32.mrf.mxu1  ;;  %v2508_v6 = vpop.f32.mrf.mxu0 }
 0x326   : > { %v1969_v8 = vpop.f32.mrf.mxu0 }
 0x327   : > { %v2009_v10 = vpop.f32.mrf.mxu1 }
 0x328   : > { %v2018_v14 = vpack.c.bf16 %v2009_v10, %v1966_v5  ;;  %v2509_v16 = vpop.f32.mrf.mxu0 }
 0x329   : > { %v2514_v24 = vpop.f32.mrf.mxu1 }
 0x32a   : > { %2524 = vmatprep.subr.bf16.mxu1 %v2018_v14 }
 0x32b   : > { %v2012_v55 = vpop.f32.mrf.mxu1  ;;  %2525 = vmatpush3.bf16.msra.mxu1 %v2018_v14 }
 0x32c   : > { %2526 = vmatprep.subr.bf16.mxu1 %v2017_v15 }
 0x32d   : > { %v2515_v7 = vpop.f32.mrf.mxu1 }
 0x32f   : > { %2527 = vmatpush3.bf16.msra.mxu1 %v2017_v15 }
 0x332   : > { %2529 = vmatmul.mubr.msk.bf16.vlgmr.msra.gmra.mxu1 %vm2045_vm10, %v2575_v59 }
 0x3e1   : > { %v2522_v20 = vpop.f32.mrf.mxu0 }
 0x3e2   : > { %v2095_v40 = vadd.f32 %v2522_v20, %v2035_v49 }
 0x3e3   : > { %v2086_v2 = vpop.f32.mrf.mxu0 }
 0x3e4   : > { %2150 = vst [vmem:[%s474_s17 + $0x10] sm:$0xf] %v2095_v40  ;;  %v2087_v18 = vadd.f32 %v2086_v2, %v2025_v12 }
 0x3e5   : > { %v2523_v63 = vpop.f32.mrf.mxu0 }
 0x3e6   : > { %2148 = vst [vmem:[%s474_s17] sm:$0xff] %v2087_v18 }
 0x3e7   : > { %v2089_v25 = vpop.f32.mrf.mxu0 }
 0x3e8   : > { %v2090_v26 = vadd.f32 %v2089_v25, %v2030_v23 }
 0x3ea   : > { %2149 = vst [vmem:[%s474_s17 + $0x8] sm:$0xff] %v2090_v26 }
 0x3f2   : > { %v2530_v52 = vpop.f32.mrf.mxu1 }
 0x3f3   : > { %v2143_v22 = vadd.f32 %v2530_v52, %v2035_v49 }
 0x3f4   : > { %v2134_v28 = vpop.f32.mrf.mxu1 }
 0x3f5   : > { %2153 = vst [vmem:[%s474_s17 + $0x28] sm:$0xf] %v2143_v22  ;;  %v2135_v36 = vadd.f32 %v2134_v28, %v2025_v12 }
 0x3f6   : > { %v2531_v17 = vpop.f32.mrf.mxu1 }
 0x3f7   : > { %2151 = vst [vmem:[%s474_s17 + $0x18] sm:$0xff] %v2135_v36 }
 0x3f8   : > { %v2137_v58 = vpop.f32.mrf.mxu1 }
 0x3f9   : > { %v2138_v60 = vadd.f32 %v2137_v58, %v2030_v23 }
 0x3fb   : > { %2152 = vst [vmem:[%s474_s17 + $0x20] sm:$0xff] %v2138_v60 }
 0x3fc PF: > { %s21_s19 = sadd.s32 1, %s2646_s19   ;;  %s3087_s17 = smov %s2642_s18 }
 0x3fd   : > { %p18_p5 = scmp.ge.s32.totalorder %s21_s19, 4   ;;  %s3088_s18 = smov %s3090_s20 }
 0x3ff   :  { %20 = sbr.rel (!%p18_p5) target bundleno = 2 (0x2), region = 100 }

</bundles_post_ra>
